<compile_context>
chip_gen: v5e
topology: v5e:2x2
jax: 0.10.0
libtpu: 0.0.40
codegen_flags: <defaults>
</compile_context>

<pallas_src>
import functools
import math

import jax
import jax.numpy as jnp
from jax.experimental import pallas as pl
from jax.experimental.pallas import tpu as pltpu

# Preferred lane widths (multiples of 128): fully unmasked lane-dense stores.
_LANE_WIDTHS = (1024, 512, 256, 128)
# Row-block alignment: 32 covers packed min tiles for bf16 (16,128) and
# int8/fp8 (32,128); free for f32.
_ROW_ALIGN = 32
# Keep at least this many grid steps so prologue/epilogue DMA is overlapped
# and both v7x TensorCores get slices of the "parallel" axis.
_MIN_GRID_STEPS = 8


@functools.lru_cache(maxsize=1)
def _chip_defaults():
    """(target_block_bytes, vmem_limit_bytes or None), chosen per generation."""
    try:
        kind = jax.devices()[0].device_kind.lower()
    except Exception:  # pragma: no cover - be conservative if query fails
        kind = ""
    if "v7" in kind:
        # 4 buffers x 6 MiB = 24 MiB; raise scoped limit (default 32 MiB) for
        # headroom, still far under the 64 MiB physical VMEM per TC.
        return 6 * 1024 * 1024, 48 << 20
    if "v6" in kind:
        # 4 buffers x 4 MiB = 16 MiB, fits the 32 MiB default scoped limit.
        return 4 * 1024 * 1024, None
    # v5e (16 MiB default scoped limit) and anything unknown: stay at 2 MiB.
    return 2 * 1024 * 1024, None


def _jumprelu_kernel(x_ref, o_ref, *, thresh):
    x = x_ref[...]
    # Faithful to torch's `arr[arr <= thresh] = 0`: NaN <= thresh is False,
    # so NaNs pass through unchanged.
    o_ref[...] = jnp.where(x <= thresh, jnp.zeros_like(x), x)


def _run_2d(x2d, thresh):
    rows, width = x2d.shape
    itemsize = jnp.dtype(x2d.dtype).itemsize
    target_bytes, vmem_limit = _chip_defaults()

    # Rows per block: ~target_bytes worth, a multiple of _ROW_ALIGN.
    block_rows = (target_bytes // (width * itemsize)) // _ROW_ALIGN * _ROW_ALIGN
    block_rows = max(_ROW_ALIGN, block_rows)
    # Keep at least ~_MIN_GRID_STEPS grid steps on mid-sized inputs.
    cap = pl.cdiv(pl.cdiv(rows, _MIN_GRID_STEPS), _ROW_ALIGN) * _ROW_ALIGN
    block_rows = min(block_rows, cap)
    if block_rows >= rows:
        block_rows = rows  # full-extent block: always legal, any dtype

    grid = (pl.cdiv(rows, block_rows),)  # Pallas masks the ragged last block.
    n = rows * width

    return pl.pallas_call(
        functools.partial(_jumprelu_kernel, thresh=thresh),
        out_shape=jax.ShapeDtypeStruct((rows, width), x2d.dtype),
        grid=grid,
        in_specs=[pl.BlockSpec((block_rows, width), lambda i: (i, 0))],
        out_specs=pl.BlockSpec((block_rows, width), lambda i: (i, 0)),
        compiler_params=pltpu.CompilerParams(
            dimension_semantics=("parallel",),  # lets v7x shard over its 2 TCs
            vmem_limit_bytes=vmem_limit,
        ),
        cost_estimate=pl.CostEstimate(
            flops=n, transcendentals=0, bytes_accessed=2 * n * itemsize),
    )(x2d)


def _find_width(n):
    """Largest lane width so that reshape(flat, (n // w, w)) is free."""
    for w in _LANE_WIDTHS:  # multiples of 128: fully unmasked stores
        if n % w == 0:
            return w
    # Any divisor in [128, 1024]: full-extent last dim is legal even when it is
    # not a multiple of 128, and >=128 keeps the slab lane-dense. Still one
    # single HBM pass (no pad / slice).
    for w in range(1024, 127, -1):
        if n % w == 0:
            return w
    return None


def jump_relu(x, jump=0.0):
    """JumpReLU forward: zero elements <= e**jump. Any rank, same shape/dtype."""
    thresh = float(math.e ** jump)
    orig_shape = x.shape
    n = int(x.size)
    if n == 0:
        return x

    flat = x.reshape(-1)  # contiguous flatten: layout-preserving, free in XLA

    w = _find_width(n)
    if w is not None:
        out2d = _run_2d(flat.reshape(n // w, w), thresh)
        return out2d.reshape(orig_shape)

    # Last resort (no divisor in [128, 1024]; e.g. prime or tiny n): pad up to
    # a 128-lane multiple, run, slice back.  Padded zeros satisfy
    # 0 <= thresh (= e**jump > 0), so they stay zero.
    # TODO(synk): could be single-pass via a scalar-prefetched length + masked
    # store if this path ever matters for large tensors.
    width = _LANE_WIDTHS[-1]
    padded = pl.cdiv(n, width) * width
    flat = jnp.pad(flat, (0, padded - n))
    out2d = _run_2d(flat.reshape(padded // width, width), thresh)
    return out2d.reshape(-1)[:n].reshape(orig_shape)


def jump_relu_ref(x, jump=0.0):
    thresh = math.e ** jump
    return jnp.where(x <= thresh, jnp.zeros_like(x), x)


if __name__ == "__main__":
    key = jax.random.PRNGKey(0)
    ks = jax.random.split(key, 4)

    # NCHW-style activation tensor, like the PyTorch module would see.
    x = jax.random.normal(ks[0], (2, 4, 16, 16), dtype=jnp.float32) * 2.0
    out = jax.block_until_ready(jump_relu(x, jump=0.0))
    ref = jump_relu_ref(x, jump=0.0)
    assert out.shape == x.shape and out.dtype == x.dtype
    assert jnp.array_equal(out, ref), "mismatch vs reference (main path)"

    # Element count not a multiple of 128 (single-pass ragged path), jump=0.5.
    x2 = jax.random.normal(ks[1], (3, 5, 24, 24), dtype=jnp.float32) * 2.0
    out2 = jax.block_until_ready(jump_relu(x2, jump=0.5))
    assert out2.shape == x2.shape and out2.dtype == x2.dtype
    assert jnp.array_equal(out2, jump_relu_ref(x2, jump=0.5)), "mismatch (ragged)"

    # Multi-step grid + NaN pass-through semantics (torch's masked assign
    # leaves NaN untouched because NaN <= thresh is False).
    x3 = jax.random.normal(ks[2], (2, 16, 64, 128), dtype=jnp.float32) * 2.0
    x3 = x3.at[0, 0, 0, 0].set(jnp.nan)
    out3 = jax.block_until_ready(jump_relu(x3, jump=0.0))
    ref3 = jump_relu_ref(x3, jump=0.0)
    assert bool(jnp.isnan(out3[0, 0, 0, 0])), "NaN should pass through"
    assert jnp.array_equal(out3, ref3, equal_nan=True), "mismatch (multi-step)"

    # bf16 input exercises the 32-row (packed-tile-safe) block alignment.
    x4 = (jax.random.normal(ks[3], (2, 4, 16, 16), dtype=jnp.float32) * 2.0
          ).astype(jnp.bfloat16)
    out4 = jax.block_until_ready(jump_relu(x4, jump=0.0))
    assert out4.shape == x4.shape and out4.dtype == jnp.bfloat16
    assert jnp.array_equal(out4, jump_relu_ref(x4, jump=0.0)), "mismatch (bf16)"

    print("KERNEL_OK")
</pallas_src>

<mosaic_0001>
module attributes {stable_mosaic.version = 11 : i64} {
  func.func @_jumprelu_kernel(%arg0: i32, %arg1: memref<2x1024xf32, #tpu.memory_space<vmem>>, %arg2: memref<2x1024xf32, #tpu.memory_space<vmem>>) attributes {dimension_semantics = [#tpu.dimension_semantics<parallel>], iteration_bounds = array<i64: 1>, scalar_prefetch = 0 : i64, scratch_operands = 0 : i64, tpu.core_type = #tpu.core_type<tc>, window_params = [{transform_indices = @transform_0, window_bounds = array<i64: 2, 1024>}, {transform_indices = @transform_1, window_bounds = array<i64: 2, 1024>}]} {
    %c0 = arith.constant 0 : index
    %c0_0 = arith.constant 0 : index
    %0 = vector.load %arg1[%c0, %c0_0] : memref<2x1024xf32, #tpu.memory_space<vmem>>, vector<2x1024xf32>
    %cst = arith.constant 1.000000e+00 : f32
    %1 = vector.broadcast %cst : f32 to vector<2x1024xf32>
    %2 = arith.cmpf ole, %0, %1 : vector<2x1024xf32>
    %cst_1 = arith.constant 0.000000e+00 : f32
    %3 = vector.broadcast %cst_1 : f32 to vector<2x1024xf32>
    %4 = arith.select %2, %3, %0 : vector<2x1024xi1>, vector<2x1024xf32>
    %c0_2 = arith.constant 0 : index
    %c0_3 = arith.constant 0 : index
    %5 = vector.load %arg2[%c0_2, %c0_3] : memref<2x1024xf32, #tpu.memory_space<vmem>>, vector<2x1024xf32>
    tpu.vector_store %arg2[%c0_2, %c0_3], %4 {strides = array<i32>} : memref<2x1024xf32, #tpu.memory_space<vmem>>, vector<2x1024xf32>,
    return
  }
  func.func @transform_0(%arg0: i32) -> (i32, i32) {
    %c0_i32 = arith.constant 0 : i32
    %c0_i32_0 = arith.constant 0 : i32
    return %arg0, %c0_i32 : i32, i32
  }
  func.func @transform_1(%arg0: i32) -> (i32, i32) {
    %c0_i32 = arith.constant 0 : i32
    %c0_i32_0 = arith.constant 0 : i32
    return %arg0, %c0_i32 : i32, i32
  }
}

</mosaic_0001>

<bundles_post_ra>
// kernel: tpu_custom_call.1
= control target key start
LH: loop header
LB: loop body
LE: loop exit
PB: predicated region body
PF: predicated region fallthrough
CT: control target
= control target key end

     0   :  { %6 = vsyncpa [#allocation3], 0  ;;  %s120_s0 = inlined_call_operand.hbm [shape: f32[2,1024], index: 0, kind: input, shape index: {}]   ;;  %s121_s1 = inlined_call_operand.hbm [shape: f32[2,1024], index: 1, kind: output, shape index: {}]  }
   0x1   :  { %7 = vsyncpa [#allocation4], 0  ;;  %s13_s8 = sshll.u32 %s120_s0, 4  ;;  %s102_s9 = smov [#allocation2]   ;;  %s14_s8 = int_to_ptr.hbm [resolvable:$true] %s13_s8 }
   0x2   :  { %s15_s10 = sshll.u32 %s102_s9, 4  ;;  %s16_s10 = int_to_ptr.vmem [resolvable:$true] %s15_s10 }
   0x3   :  { %18 = dma.hbm_to_vmem [thread:$0]  %s14_s8, 256, %s16_s10, [#allocation3]  }
   0x4   :  { %98 = dma.done.wait [#allocation3], 256  }
   0x5   :  { %99 = vsyncadd [#allocation3], 4294967040  ;;  %s103_s11 = smov [#allocation5]   ;;  %s38_s15 = sshll.u32 %s121_s1, 4  ;;  %v23_v0 = vld [vmem:[#allocation2] sm:$0xff]  ;;  %v24_v1 = vld [vmem:[#allocation2 + $0x8] sm:$0xff]  ;;  %s39_s15 = int_to_ptr.hbm [resolvable:$true] %s38_s15 }
   0x6   :  { %s36_s12 = sshll.u32 %s103_s11, 4  ;;  %vm25_vm0 = vcmp.le.f32.partialorder %v23_v0, 1.0  ;;  %vm26_vm1 = vcmp.le.f32.partialorder %v24_v1, 1.0  ;;  %s37_s12 = int_to_ptr.vmem [resolvable:$true] %s36_s12 }
   0x7   :  { %v27_v2 = vsel %vm25_vm0, 0.0, %v23_v0  ;;  %v28_v3 = vsel %vm26_vm1, 0.0, %v24_v1 }
   0x8   :  { %29 = vst [vmem:[#allocation5] sm:$0xff] %v27_v2 }
   0x9   :  { %30 = vst [vmem:[#allocation5 + $0x8] sm:$0xff] %v28_v3 }
   0xa   :  { %41 = dma.vmem_to_hbm [thread:$0]  %s37_s12, 256, %s39_s15, [#allocation4]  }
   0xb   :  { %100 = dma.done.wait [#allocation4], 256  }
   0xc   :  { %101 = vsyncadd [#allocation4], 4294967040 }
   0xd   :  { %46 = vsyncpa [#allocation3], 1 }
   0xe   :  { %47 = vsyncpa [#allocation4], 1 }

</bundles_post_ra>
